<compile_context>
chip_gen: v7x
topology: tpu7x:2x2x1
jax: 0.10.0
libtpu: 0.0.40
codegen_flags: <defaults>
</compile_context>

<pallas_src>
import functools

import jax
import jax.numpy as jnp
from jax.experimental import pallas as pl
from jax.experimental.pallas import tpu as pltpu


def _layernorm_kernel(x_ref, alpha_ref, beta_ref, o_ref, *, eps):
    # x_ref: (TILE_ROWS, D); alpha_ref / beta_ref: (1, D) (VMEM-resident,
    # constant index_map -> no per-step DMA).
    x = x_ref[...].astype(jnp.float32)
    d = x.shape[-1]

    # One-pass moments: both cross-lane (XLU) reductions issue back-to-back.
    sum_x = jnp.sum(x, axis=-1, keepdims=True)
    sum_x2 = jnp.sum(x * x, axis=-1, keepdims=True)
    mean = sum_x * (1.0 / d)
    # torch.var default is unbiased (divide by D-1) -- matches the module spec.
    var = (sum_x2 - sum_x * mean) * (1.0 / (d - 1))

    rstd = jax.lax.rsqrt(var + eps)                     # (tr, 1)
    # Fuse the affine into the normalization scale (HBM-bound; VPU has slack).
    scale = alpha_ref[...].astype(jnp.float32) * rstd   # (1,D)*(tr,1) -> (tr,D)
    out = (x - mean) * scale + beta_ref[...].astype(jnp.float32)
    o_ref[...] = out.astype(o_ref.dtype)


def _pick_tile_rows(rows, d, itemsize, vmem_budget_bytes=16 << 20):
    """Row-tile size: largest dtype-aligned tile whose ~4 live copies
    (double-buffered input + double-buffered output) fit the VMEM budget,
    while keeping >= 4 grid steps when there is enough work (v7x megacore:
    2 TensorCores x >= 2 steps each so per-core DMA can be pipelined)."""
    # Sublane packing: 8 rows for 4-byte, 16 for 2-byte, 32 for 1-byte dtypes.
    align = max(8, 32 // itemsize)
    cap = vmem_budget_bytes // (4 * d * itemsize)
    cap = max(align, (cap // align) * align)
    # Target at least 4 grid steps (quarter of the rows, aligned up).
    quarter = -(-rows // 4)
    quarter = ((quarter + align - 1) // align) * align
    return max(align, min(cap, quarter))


def layer_normalization(x, alpha, beta, *, eps=1e-05):
    """x: (B, S, D); alpha, beta: (1, 1, D). Returns (B, S, D).

    D should ideally be a multiple of 128 for lane-dense stores (the module
    default dimension=256 satisfies this)."""
    B, S, D = x.shape
    rows = B * S
    x2 = x.reshape(rows, D)
    a2 = alpha.reshape(1, D)
    b2 = beta.reshape(1, D)

    itemsize = jnp.dtype(x.dtype).itemsize
    tr = _pick_tile_rows(rows, D, itemsize)
    grid = pl.cdiv(rows, tr)  # ragged last block handled by Pallas (no pad/slice)

    param_itemsize = jnp.dtype(alpha.dtype).itemsize
    cost = pl.CostEstimate(
        flops=8 * rows * D,
        transcendentals=rows,
        bytes_accessed=2 * rows * D * itemsize + 2 * D * param_itemsize,
    )

    kernel = functools.partial(_layernorm_kernel, eps=eps)

    out2 = pl.pallas_call(
        kernel,
        out_shape=jax.ShapeDtypeStruct((rows, D), x.dtype),
        grid_spec=pltpu.PrefetchScalarGridSpec(
            num_scalar_prefetch=0,
            grid=(grid,),
            in_specs=[
                pl.BlockSpec((tr, D), lambda i: (i, 0)),
                pl.BlockSpec((1, D), lambda i: (0, 0)),
                pl.BlockSpec((1, D), lambda i: (0, 0)),
            ],
            out_specs=pl.BlockSpec((tr, D), lambda i: (i, 0)),
        ),
        compiler_params=pltpu.CompilerParams(
            dimension_semantics=("parallel",),
            # Explicit so the ~16 MiB of double-buffered tiles fit regardless
            # of the per-chip scoped-VMEM default (v5e 16 MiB / v6e 32 / v7x 32);
            # 32 MiB is within physical VMEM on all of v5e/v6e/v7x.
            vmem_limit_bytes=32 << 20,
        ),
        cost_estimate=cost,
    )(x2, a2, b2)

    return out2.reshape(B, S, D)


if __name__ == "__main__":
    # Module default dimension=256 (multiple of 128 -> lane-dense output).
    B, S, D = 2, 8, 256
    eps = 1e-05

    key = jax.random.PRNGKey(0)
    x = jax.random.normal(key, (B, S, D), dtype=jnp.float32)

    # Deterministic parameter init matching nn.Parameter(ones / zeros)
    alpha = jnp.ones((1, 1, D), dtype=jnp.float32)
    beta = jnp.zeros((1, 1, D), dtype=jnp.float32)

    out = layer_normalization(x, alpha, beta, eps=eps)
    out = jax.block_until_ready(out)

    # Reference check (pure JAX, mirrors torch semantics: unbiased variance)
    mean = jnp.mean(x, axis=-1, keepdims=True)
    var = jnp.sum((x - mean) ** 2, axis=-1, keepdims=True) / (D - 1)
    ref = alpha * ((x - mean) / jnp.sqrt(var + eps)) + beta
    assert jnp.allclose(out, ref, atol=1e-4, rtol=1e-4), "mismatch vs reference"

    print("KERNEL_OK")
</pallas_src>

<mosaic_0001>
module attributes {stable_mosaic.version = 11 : i64} {
  func.func @_layernorm_kernel(%arg0: i32, %arg1: memref<8x256xf32, #tpu.memory_space<vmem>>, %arg2: memref<1x256xf32, #tpu.memory_space<vmem>>, %arg3: memref<1x256xf32, #tpu.memory_space<vmem>>, %arg4: memref<8x256xf32, #tpu.memory_space<vmem>>) attributes {dimension_semantics = [#tpu.dimension_semantics<parallel>], iteration_bounds = array<i64: 2>, scalar_prefetch = 0 : i64, scratch_operands = 0 : i64, tpu.core_type = #tpu.core_type<tc>, window_params = [{transform_indices = @transform_0, window_bounds = array<i64: 8, 256>}, {pipeline_mode = #tpu.pipeline_mode<synchronous>, transform_indices = @transform_1, window_bounds = array<i64: 1, 256>}, {pipeline_mode = #tpu.pipeline_mode<synchronous>, transform_indices = @transform_2, window_bounds = array<i64: 1, 256>}, {transform_indices = @transform_3, window_bounds = array<i64: 8, 256>}]} {
    %c0 = arith.constant 0 : index
    %c0_0 = arith.constant 0 : index
    %0 = vector.load %arg1[%c0, %c0_0] : memref<8x256xf32, #tpu.memory_space<vmem>>, vector<8x256xf32>
    %cst = arith.constant dense<0.000000e+00> : vector<8xf32>
    %1 = vector.multi_reduction <add>, %0, %cst [1] : vector<8x256xf32> to vector<8xf32>
    %2 = vector.shape_cast %1 : vector<8xf32> to vector<8x1xf32>
    %3 = arith.mulf %0, %0 : vector<8x256xf32>
    %cst_1 = arith.constant dense<0.000000e+00> : vector<8xf32>
    %4 = vector.multi_reduction <add>, %3, %cst_1 [1] : vector<8x256xf32> to vector<8xf32>
    %5 = vector.shape_cast %4 : vector<8xf32> to vector<8x1xf32>
    %cst_2 = arith.constant 3.906250e-03 : f32
    %6 = vector.broadcast %cst_2 : f32 to vector<8x1xf32>
    %7 = arith.mulf %2, %6 : vector<8x1xf32>
    %8 = arith.mulf %2, %7 : vector<8x1xf32>
    %9 = arith.subf %5, %8 : vector<8x1xf32>
    %cst_3 = arith.constant 0.00392156886 : f32
    %10 = vector.broadcast %cst_3 : f32 to vector<8x1xf32>
    %11 = arith.mulf %9, %10 : vector<8x1xf32>
    %cst_4 = arith.constant 9.99999974E-6 : f32
    %12 = vector.broadcast %cst_4 : f32 to vector<8x1xf32>
    %13 = arith.addf %11, %12 : vector<8x1xf32>
    %14 = math.rsqrt %13 : vector<8x1xf32>
    %c0_5 = arith.constant 0 : index
    %c0_6 = arith.constant 0 : index
    %15 = vector.load %arg2[%c0_5, %c0_6] : memref<1x256xf32, #tpu.memory_space<vmem>>, vector<1x256xf32>
    %16 = vector.broadcast %15 : vector<1x256xf32> to vector<8x256xf32>
    %17 = vector.broadcast %14 : vector<8x1xf32> to vector<8x256xf32>
    %18 = arith.mulf %16, %17 : vector<8x256xf32>
    %19 = vector.broadcast %7 : vector<8x1xf32> to vector<8x256xf32>
    %20 = arith.subf %0, %19 : vector<8x256xf32>
    %21 = arith.mulf %20, %18 : vector<8x256xf32>
    %c0_7 = arith.constant 0 : index
    %c0_8 = arith.constant 0 : index
    %22 = vector.load %arg3[%c0_7, %c0_8] : memref<1x256xf32, #tpu.memory_space<vmem>>, vector<1x256xf32>
    %23 = vector.broadcast %22 : vector<1x256xf32> to vector<8x256xf32>
    %24 = arith.addf %21, %23 : vector<8x256xf32>
    %c0_9 = arith.constant 0 : index
    %c0_10 = arith.constant 0 : index
    %25 = vector.load %arg4[%c0_9, %c0_10] : memref<8x256xf32, #tpu.memory_space<vmem>>, vector<8x256xf32>
    tpu.vector_store %arg4[%c0_9, %c0_10], %24 {strides = array<i32>} : memref<8x256xf32, #tpu.memory_space<vmem>>, vector<8x256xf32>,
    return
  }
  func.func @transform_0(%arg0: i32) -> (i32, i32) {
    %c0_i32 = arith.constant 0 : i32
    %c0_i32_0 = arith.constant 0 : i32
    return %arg0, %c0_i32 : i32, i32
  }
  func.func @transform_1(%arg0: i32) -> (i32, i32) {
    %c0_i32 = arith.constant 0 : i32
    %c0_i32_0 = arith.constant 0 : i32
    %c0_i32_1 = arith.constant 0 : i32
    return %c0_i32, %c0_i32_0 : i32, i32
  }
  func.func @transform_2(%arg0: i32) -> (i32, i32) {
    %c0_i32 = arith.constant 0 : i32
    %c0_i32_0 = arith.constant 0 : i32
    %c0_i32_1 = arith.constant 0 : i32
    return %c0_i32, %c0_i32_0 : i32, i32
  }
  func.func @transform_3(%arg0: i32) -> (i32, i32) {
    %c0_i32 = arith.constant 0 : i32
    %c0_i32_0 = arith.constant 0 : i32
    return %arg0, %c0_i32 : i32, i32
  }
}

</mosaic_0001>

<bundles_post_ra>
// kernel: tpu_custom_call.1
= control target key start
LH: loop header
LB: loop body
LE: loop exit
PB: predicated region body
PF: predicated region fallthrough
CT: control target
= control target key end

     0   :  { %8 = vsyncpa [#allocation3], 0  ;;  %s677_s0 = inlined_call_operand.hbm [shape: f32[16,256], index: 0, kind: input, shape index: {}]   ;;  %s678_s1 = inlined_call_operand.vmem [shape: f32[1,256], index: 1, kind: input, shape index: {}]   ;;  %s679_s2 = inlined_call_operand.vmem [shape: f32[1,256], index: 2, kind: input, shape index: {}]   ;;  %s680_s3 = inlined_call_operand.hbm [shape: f32[16,256], index: 3, kind: output, shape index: {}]  }
   0x1   :  { %10 = vsyncpa [#allocation3 + $0x1], 0 }
   0x2   :  { %11 = vsyncpa [#allocation4], 0 }
   0x3   :  { %13 = vsyncpa [#allocation4 + $0x1], 0  ;;  %s506_s12 = smov 0   ;;  %s508_s13 = smov 0  }
   0x4   :  { %s510_s14 = smov 0   ;;  %s512_s15 = smov 0  }
   0x5 LB: > { %s527_s16 = sadd.s32 4294967295, %s482_s15   ;;  %s322_s17 = sadd.s32 4294967294, %s482_s15   ;;  %s482_s15 = sphi %s512_s15, %s695_s15   ;;  %s478_s14 = sphi %s510_s14, %s694_s14   ;;  %s474_s13 = sphi %s508_s13, %s693_s13   ;;  %s470_s12 = sphi %s506_s12, %s692_s12  }
   0x6   : > { %s531_s18 = sadd.s32 1, %s482_s15   ;;  %s26_s19 = sadd.s32 1, %s478_s14 }
   0x7   : > { %s23_s20 = ssub.s32 %s482_s15, %s531_s18  ;;  %p33_p0 = scmp.ne.s32.totalorder %s478_s14, %s474_s13 }
   0x8   : > { %p24_p1 = scmp.eq.s32.totalorder %s23_s20, 0  ;;  %p34_p2 = scmp.eq.s32.totalorder %s482_s15, 0 }
   0x9   : > { %p39_p3 = scmp.ne.s32.totalorder %s474_s13, %s470_s12  ;;  %p40_p4 = scmp.eq.s32.totalorder %s527_s16, 0 }
   0xa   : > { %s543_s21 = scalar_select %p24_p1, %s478_s14, %s26_s19  }
   0xb   : > { %p545_p5 = por %p34_p2, %p33_p0  ;;  %p549_p6 = por %p40_p4, %p39_p3 }
   0xc   : > { %p105_p7 = scmp.eq.s32.totalorder %s527_s16, 1  ;;  %p111_p8 = scmp.eq.s32.totalorder %s322_s17, 1 }
   0xd   : > { %p350_p10 = scmp.lt.s32.totalorder %s482_s15, 2  ;;  %s137_s26 = sand.u32 1, %s478_s14  }
   0xe   : > { %p556_p11 = por %p105_p7, %p33_p0  ;;  %p560_p12 = por %p111_p8, %p39_p3 }
   0xf   : > { %s336_s27 = sshll.u32 %s482_s15, 8  ;;  %s325_s28 = sshll.u32 %s137_s26, 4 }
  0x10   : > { %s684_s24 = scalar_select %p556_p11, 1, 0 }
  0x11   : > { %s685_s25 = scalar_select %p560_p12, 1, 0 }
  0x12   : > { %s569_s4 = scalar_lea.hbm %s677_s0, %s336_s27  ;;  %s141_s5 = scalar_lea.vmem [#allocation2], %s325_s28 }
  0x13   : > { %s149_s6 = sshll.u32 %s141_s5, 4  ;;  %p573_p13 = pnand %p350_p10, %p545_p5  ;;  %s577_s6 = int_to_ptr.vmem [resolvable:$true] %s149_s6 }
  0x14   : > { %s138_s8 = scalar_lea.sflag [#allocation3], %s137_s26  ;;  %s386_s9 = scalar_lea.hbm %s569_s4, 256 }
  0x15   : > { %p387_p2 = scmp.ne.s32.totalorder %s569_s4, %s386_s9  ;;  %p388_p3 = pneg %p573_p13 }
  0x16   : > { %s391_s17 = scalar_lea.hbm %s677_s0, 512  ;;  %p392_p5 = scmp.lt.u32.totalorder %s569_s4, %s677_s0 }
  0x17   : > { %p389_p4 = pnand %p388_p3, %p387_p2  ;;  %p393_p8 = scmp.lt.u32.totalorder %s391_s17, %s386_s9 }
  0x18   : > { %p395_p9 = scmp.lt.u32.totalorder %s386_s9, %s569_s4 }
  0x19   : > { %p390_p7 = pneg %p389_p4  ;;  %p394_p10 = por %p393_p8, %p392_p5 }
  0x1b   : > { %p396_p0 = por %p395_p9, %p394_p10 }
  0x1d   : > { %p397_p1 = pnand %p396_p0, %p390_p7 }
  0x1f   : > { %400 = shalt.err (!%p397_p1)
}
  0x20   : > { %s401_s22 = scalar_lea.vmem %s577_s6, 256  ;;  %s484_s26 = smov [#allocation2]  }
  0x21   : > { %p402_p2 = scmp.ne.s32.totalorder %s577_s6, %s401_s22  ;;  %s406_s27 = sshll.u32 %s484_s26, 4  ;;  %s407_s27 = int_to_ptr.vmem [resolvable:$false] %s406_s27 }
  0x22   : > { %s408_s28 = scalar_lea.vmem %s407_s27, 512  ;;  %p409_p11 = scmp.lt.s32.totalorder %s577_s6, %s407_s27 }
  0x23   : > { %p404_p4 = pnand %p402_p2, %p388_p3  ;;  %p410_p5 = scmp.lt.s32.totalorder %s408_s28, %s401_s22 }
  0x25   : > { %p405_p12 = pneg %p404_p4  ;;  %p411_p8 = por %p410_p5, %p409_p11 }
  0x27   : > { %p412_p9 = pnand %p411_p8, %p405_p12 }
  0x29   : > { %415 = shalt.err (!%p412_p9)
}
  0x2a   : > { %345 = dma.hbm_to_vmem [thread:$0]  (!%p573_p13), %s569_s4, 256, %s577_s6, %s138_s8  }
  0x2b   : > { %p687_p0 = scmp.lt.s32.totalorder %s482_s15, 3  ;;  %p688_p1 = scmp.ge.s32.totalorder %s482_s15, 1 }
  0x2d   : > { %p155_p3 = pnand %p688_p1, %p687_p0 }
  0x2e   : > { %s611_s29 = sand.u32 (!%p155_p3), 1, %s474_s13  }
  0x2f   : > { %158 = sbr.rel (%p155_p3) target bundleno = 241 (0xf1), region = 32  ;;  %s329_s30 = sshll.u32 (!%p155_p3), %s611_s29, 4 }
  0x30   : > { %s161_s5 = scalar_lea.sflag (!%p155_p3), [#allocation3], %s611_s29  ;;  %s164_s7 = scalar_lea.vmem (!%p155_p3), [#allocation2], %s329_s30 }
  0x36   : > { %461 = dma.done.wait (%p549_p6), %s161_s5, 256  }
  0x37   : > { %463 = vsyncadd (%p549_p6), %s161_s5, 4294967040  ;;  %v187_v0 = vld [vmem:[%s164_s7] sm:$0xff]  ;;  %v188_v1 = vld [vmem:[%s164_s7 + $0x8] sm:$0xff]  ;;  %v205_v11 = vlaneseq  ;;  %s337_s9 = sshll.u32 %s527_s16, 8  ;;  %s186_s10 = scalar_lea.vmem [#allocation5], %s329_s30 }
  0x38   : > { %v189_v2 = vadd.f32 %v188_v1, %v187_v0  ;;  %v192_v3 = vmul.f32 %v187_v0, %v187_v0  ;;  %v193_v4 = vmul.f32 %v188_v1, %v188_v1  ;;  %v203_v17 = vld [vmem:[%s678_s1] sm:$0x3]  ;;  %s252_s11 = sshll.u32 %s186_s10, 4  ;;  %s633_s20 = scalar_lea.hbm %s680_s3, %s337_s9  ;;  %s635_s11 = int_to_ptr.vmem [resolvable:$true] %s252_s11 }
  0x39   : > { %v206_v14 = vshrl.u32 %v205_v11, 7  ;;  %v221_v20 = vld [vmem:[%s679_s2] sm:$0x3]  ;;  %s238_s16 = scalar_lea.sflag [#allocation4], %s611_s29  ;;  %s416_s22 = scalar_lea.vmem %s635_s11, 256 }
  0x3a   : > { %190 = vadd.xlane.f32.xlu0 %v189_v2  ;;  %v194_v5 = vadd.f32 %v193_v4, %v192_v3  ;;  %p417_p6 = scmp.ne.s32.totalorder %s635_s11, %s416_s22  ;;  %p689_p11 = scmp.ne.s32.totalorder %s684_s24, 0 }
  0x3b   : > { %v207_v15 = vsub.s32 0, %v206_v14  ;;  %v211_v16 = vsub.s32 1, %v206_v14  ;;  %s485_s26 = smov [#allocation5]  }
  0x3c   : > { %p418_p12 = pnand %p417_p6, %p689_p11  ;;  %s420_s27 = sshll.u32 %s485_s26, 4  ;;  %s421_s27 = int_to_ptr.vmem [resolvable:$false] %s420_s27 }
  0x3d   : > { %v208_v18 = vrot.slane %v203_v17, %v207_v15  ;;  %v212_v19 = vrot.slane %v203_v17, %v211_v16  ;;  %v226_v22 = vrot.slane %v221_v20, %v207_v15  ;;  %v230_v23 = vrot.slane %v221_v20, %v211_v16  ;;  %s422_s28 = scalar_lea.vmem %s421_s27, 512  ;;  %p423_p7 = scmp.lt.s32.totalorder %s635_s11, %s421_s27 }
  0x3e   : > { %195 = vadd.xlane.f32.xlu0 %v194_v5  ;;  %p419_p13 = pneg %p418_p12  ;;  %p424_p10 = scmp.lt.s32.totalorder %s422_s28, %s416_s22 }
  0x40   : > { %p425_p2 = por %p424_p10, %p423_p7 }
  0x42   : > { %p426_p4 = pnand %p425_p2, %p419_p13 }
  0xc7   : > { %v191_v6 = vpop.xlane.xlu0 %190 }
  0xc8   : > { %v197_v7 = vmul.f32 0.00390625, %v191_v6 }
  0xca   : > { %v198_v8 = vmul.f32 %v197_v7, %v191_v6  ;;  %v217_v24 = vsub.f32 %v187_v0, %v197_v7  ;;  %v218_v25 = vsub.f32 %v188_v1, %v197_v7 }
  0xcb   : > { %v196_v9 = vpop.xlane.xlu0 %195 }
  0xcc   : > { %v199_v10 = vsub.f32 %v196_v9, %v198_v8 }
  0xce   : > { %v200_v12 = vmul.f32 0.003921569, %v199_v10 }
  0xd0   : > { %v201_v13 = vadd.f32 1e-05, %v200_v12 }
  0xd2   : > { %384 = vrsqrt.f32 %v201_v13 }
  0xdc   : > { %v385_v21 = vpop.eup %384 }
  0xdd   : > { %v215_v26 = vmul.f32 %v385_v21, %v208_v18  ;;  %v216_v27 = vmul.f32 %v385_v21, %v212_v19 }
  0xdf   : > { %v219_v28 = vmul.f32 %v217_v24, %v215_v26  ;;  %v220_v29 = vmul.f32 %v218_v25, %v216_v27 }
  0xe1   : > { %v233_v30 = vadd.f32 %v226_v22, %v219_v28  ;;  %v234_v31 = vadd.f32 %v230_v23, %v220_v29 }
  0xe3   : > { %235 = vst [vmem:[%s186_s10] sm:$0xff] %v233_v30  ;;  %236 = vst [vmem:[%s186_s10 + $0x8] sm:$0xff] %v234_v31 }
  0xe4   : > { %429 = shalt.err (!%p426_p4)
}
  0xe5   : > { %s430_s29 = scalar_lea.hbm %s633_s20, 256  ;;  %s434_s7 = scalar_lea.hbm %s680_s3, 512 }
  0xe6   : > { %p431_p5 = scmp.ne.s32.totalorder %s633_s20, %s430_s29  ;;  %p435_p0 = scmp.lt.u32.totalorder %s633_s20, %s680_s3 }
  0xe7   : > { %p436_p1 = scmp.lt.u32.totalorder %s434_s7, %s430_s29  ;;  %p438_p6 = scmp.lt.u32.totalorder %s430_s29, %s633_s20 }
  0xe8   : > { %p432_p8 = pnand %p431_p5, %p689_p11 }
  0xe9   : > { %p437_p3 = por %p436_p1, %p435_p0 }
  0xea   : > { %p433_p9 = pneg %p432_p8 }
  0xeb   : > { %p439_p12 = por %p438_p6, %p437_p3 }
  0xed   : > { %p440_p13 = pnand %p439_p12, %p433_p9 }
  0xef   : > { %443 = shalt.err (!%p440_p13)
}
  0xf0   : > { %340 = dma.vmem_to_hbm [thread:$0]  (%p689_p11), %s635_s11, 256, %s633_s20, %s238_s16  }
  0xf1 PF: > { %s264_s6 = sand.u32 1, %s470_s12   ;;  %p690_p7 = scmp.ne.s32.totalorder %s685_s25, 0 }
  0xf2   : > { %p691_p10 = scmp.ge.s32.totalorder %s482_s15, 2  ;;  %s265_s8 = scalar_lea.sflag [#allocation4], %s264_s6 }
  0xf4   : > { %p347_p2 = pnand %p691_p10, %p690_p7 }
  0xf6   : > { %465 = dma.done.wait (!%p347_p2), %s265_s8, 256  }
  0xf7   : > { %467 = vsyncadd (!%p347_p2), %s265_s8, 4294967040  ;;  %p16_p4 = scmp.ge.s32.totalorder %s531_s18, 4   ;;  %s692_s12 = smov %s474_s13 }
  0xf8   : > { %s693_s13 = smov %s478_s14  ;;  %s694_s14 = smov %s543_s21 }
  0xf9   : > { %s695_s15 = smov %s531_s18  ;;  %18 = sbr.rel (!%p16_p4) target bundleno = 5 (0x5), region = 77 }
 0x100   :  { %270 = vsyncpa [#allocation3], 1 }
 0x101   :  { %272 = vsyncpa [#allocation3 + $0x1], 1 }
 0x102   :  { %273 = vsyncpa [#allocation4], 1 }
 0x103   :  { %275 = vsyncpa [#allocation4 + $0x1], 1 }

</bundles_post_ra>
